<compile_context>
chip_gen: v5e
topology: v5e:2x2
jax: 0.10.0
libtpu: 0.0.40
codegen_flags: <defaults>
</compile_context>

<pallas_src>
import functools

import jax
import jax.numpy as jnp
from jax.experimental import pallas as pl
from jax.experimental.pallas import tpu as pltpu


# Budget for double-buffered (input + output) blocks. Conservative so the same
# block choice is safe on v7x (64 MiB physical VMEM per TC) as well as v5e/v6e.
_BLOCK_VMEM_BUDGET_BYTES = 24 * 1024 * 1024
# Scoped VMEM limit: above v5e's 16 MiB default, with headroom on v7x.
_VMEM_LIMIT_BYTES = 32 * 1024 * 1024


def _zeropatch_pad_kernel(x_ref, o_ref, *, pad):
    # x_ref: (TB, C, H, W) VMEM tile; o_ref: (TB, C, H+2p, W+2p) VMEM tile.
    tb, c, h, w = x_ref.shape
    hp = h + 2 * pad
    wp = w + 2 * pad

    if pad > 0:
        # Zero only the four padding bands; the bulk interior is written once.
        zrow = jnp.zeros((tb, c, pad, wp), o_ref.dtype)   # top / bottom bands
        zcol = jnp.zeros((tb, c, h, pad), o_ref.dtype)    # left / right strips
        o_ref[:, :, :pad, :] = zrow
        o_ref[:, :, pad + h:hp, :] = zrow
        o_ref[:, :, pad:pad + h, :pad] = zcol
        o_ref[:, :, pad:pad + h, pad + w:wp] = zcol

    # Interior: single store of the original patch.
    # (The module's explicit boundary-patch zeroing only re-zeroes the padding
    # band above, so this reproduces the forward exactly.)
    o_ref[:, :, pad:pad + h, pad:pad + w] = x_ref[...]


def _pick_batch_tile(b, bytes_per_batch_row, budget_bytes):
    """Largest divisor of b whose double-buffered blocks fit the VMEM budget,
    while keeping the grid >= 2 steps so v7x's two TensorCores both get work."""
    cap = max(1, budget_bytes // max(1, bytes_per_batch_row))
    cap = min(cap, max(1, b // 2))
    for tb in range(min(cap, b), 0, -1):
        if b % tb == 0:
            return tb
    return 1


def zeropatch_pad2d(x, padding, num_patches):
    """Pallas implementation of ZeropatchPad2d.forward (NCHW)."""
    b, c, h, w = x.shape
    p2 = num_patches * num_patches
    assert b % p2 == 0, "batch must be divisible by num_patches**2"
    hp, wp = h + 2 * padding, w + 2 * padding
    itemsize = jnp.dtype(x.dtype).itemsize

    # Double-buffered input block + output block per batch row.
    bytes_per_batch_row = 2 * (c * h * w + c * hp * wp) * itemsize
    tb = _pick_batch_tile(b, bytes_per_batch_row, _BLOCK_VMEM_BUDGET_BYTES)

    kernel = functools.partial(_zeropatch_pad_kernel, pad=padding)
    in_bytes = b * c * h * w * itemsize
    out_bytes = b * c * hp * wp * itemsize

    return pl.pallas_call(
        kernel,
        out_shape=jax.ShapeDtypeStruct((b, c, hp, wp), x.dtype),
        grid=(b // tb,),
        in_specs=[
            # Trailing block dims equal the full array dims -> no (8,128)
            # divisibility requirement; leading dim tiles the batch.
            pl.BlockSpec((tb, c, h, w), lambda i: (i, 0, 0, 0)),
        ],
        out_specs=pl.BlockSpec((tb, c, hp, wp), lambda i: (i, 0, 0, 0)),
        compiler_params=pltpu.CompilerParams(
            dimension_semantics=("parallel",),
            vmem_limit_bytes=_VMEM_LIMIT_BYTES,
        ),
        cost_estimate=pl.CostEstimate(
            flops=0, transcendentals=0, bytes_accessed=in_bytes + out_bytes),
    )(x)


def _reference(x, padding, num_patches):
    # Pure-JAX reference mirroring the PyTorch forward. The explicit
    # boundary-patch zeroing in the module only re-zeroes the constant padding
    # band, so jnp.pad already equals the module output.
    p = padding
    return jnp.pad(x, ((0, 0), (0, 0), (p, p), (p, p)), mode="constant",
                   constant_values=0.0)


if __name__ == "__main__":
    padding = 2
    num_patches = 2            # P
    B = 2                      # images
    b = B * num_patches ** 2   # patch-batch = 8
    C, H, W = 4, 16, 16

    key = jax.random.PRNGKey(0)
    x = jax.random.normal(key, (b, C, H, W), dtype=jnp.float32)

    out = zeropatch_pad2d(x, padding, num_patches)
    out = jax.block_until_ready(out)

    ref = _reference(x, padding, num_patches)
    assert out.shape == (b, C, H + 2 * padding, W + 2 * padding)
    assert jnp.allclose(out, ref), "mismatch vs reference"
    print("KERNEL_OK")
</pallas_src>

<mosaic_0001>
module attributes {stable_mosaic.version = 11 : i64} {
  func.func @_zeropatch_pad_kernel(%arg0: i32, %arg1: memref<4x4x16x16xf32, #tpu.memory_space<vmem>>, %arg2: memref<4x4x20x20xf32, #tpu.memory_space<vmem>>) attributes {dimension_semantics = [#tpu.dimension_semantics<parallel>], iteration_bounds = array<i64: 2>, scalar_prefetch = 0 : i64, scratch_operands = 0 : i64, tpu.core_type = #tpu.core_type<tc>, window_params = [{transform_indices = @transform_0, window_bounds = array<i64: 4, 4, 16, 16>}, {transform_indices = @transform_1, window_bounds = array<i64: 4, 4, 20, 20>}]} {
    %cst = arith.constant 0.000000e+00 : f32
    %0 = vector.broadcast %cst : f32 to vector<4x4x2x20xf32>
    %cst_0 = arith.constant 0.000000e+00 : f32
    %1 = vector.broadcast %cst_0 : f32 to vector<4x4x16x2xf32>
    %c0 = arith.constant 0 : index
    %c0_1 = arith.constant 0 : index
    %c0_2 = arith.constant 0 : index
    %c0_3 = arith.constant 0 : index
    %2 = vector.load %arg2[%c0, %c0_1, %c0_2, %c0_3] : memref<4x4x20x20xf32, #tpu.memory_space<vmem>>, vector<4x4x2x20xf32>
    tpu.vector_store %arg2[%c0, %c0_1, %c0_2, %c0_3], %0 {strides = array<i32>} : memref<4x4x20x20xf32, #tpu.memory_space<vmem>>, vector<4x4x2x20xf32>,
    %c0_4 = arith.constant 0 : index
    %c0_5 = arith.constant 0 : index
    %c18 = arith.constant 18 : index
    %c0_6 = arith.constant 0 : index
    %3 = vector.load %arg2[%c0_4, %c0_5, %c18, %c0_6] : memref<4x4x20x20xf32, #tpu.memory_space<vmem>>, vector<4x4x2x20xf32>
    tpu.vector_store %arg2[%c0_4, %c0_5, %c18, %c0_6], %0 {strides = array<i32>} : memref<4x4x20x20xf32, #tpu.memory_space<vmem>>, vector<4x4x2x20xf32>,
    %c0_7 = arith.constant 0 : index
    %c0_8 = arith.constant 0 : index
    %c2 = arith.constant 2 : index
    %c0_9 = arith.constant 0 : index
    %4 = vector.load %arg2[%c0_7, %c0_8, %c2, %c0_9] : memref<4x4x20x20xf32, #tpu.memory_space<vmem>>, vector<4x4x16x2xf32>
    tpu.vector_store %arg2[%c0_7, %c0_8, %c2, %c0_9], %1 {strides = array<i32>} : memref<4x4x20x20xf32, #tpu.memory_space<vmem>>, vector<4x4x16x2xf32>,
    %c0_10 = arith.constant 0 : index
    %c0_11 = arith.constant 0 : index
    %c2_12 = arith.constant 2 : index
    %c18_13 = arith.constant 18 : index
    %5 = vector.load %arg2[%c0_10, %c0_11, %c2_12, %c18_13] : memref<4x4x20x20xf32, #tpu.memory_space<vmem>>, vector<4x4x16x2xf32>
    tpu.vector_store %arg2[%c0_10, %c0_11, %c2_12, %c18_13], %1 {strides = array<i32>} : memref<4x4x20x20xf32, #tpu.memory_space<vmem>>, vector<4x4x16x2xf32>,
    %c0_14 = arith.constant 0 : index
    %c0_15 = arith.constant 0 : index
    %c0_16 = arith.constant 0 : index
    %c0_17 = arith.constant 0 : index
    %6 = vector.load %arg1[%c0_14, %c0_15, %c0_16, %c0_17] : memref<4x4x16x16xf32, #tpu.memory_space<vmem>>, vector<4x4x16x16xf32>
    %c0_18 = arith.constant 0 : index
    %c0_19 = arith.constant 0 : index
    %c2_20 = arith.constant 2 : index
    %c2_21 = arith.constant 2 : index
    %7 = vector.load %arg2[%c0_18, %c0_19, %c2_20, %c2_21] : memref<4x4x20x20xf32, #tpu.memory_space<vmem>>, vector<4x4x16x16xf32>
    tpu.vector_store %arg2[%c0_18, %c0_19, %c2_20, %c2_21], %6 {strides = array<i32>} : memref<4x4x20x20xf32, #tpu.memory_space<vmem>>, vector<4x4x16x16xf32>,
    return
  }
  func.func @transform_0(%arg0: i32) -> (i32, i32, i32, i32) {
    %c0_i32 = arith.constant 0 : i32
    %c0_i32_0 = arith.constant 0 : i32
    %c0_i32_1 = arith.constant 0 : i32
    %c0_i32_2 = arith.constant 0 : i32
    return %arg0, %c0_i32, %c0_i32_0, %c0_i32_1 : i32, i32, i32, i32
  }
  func.func @transform_1(%arg0: i32) -> (i32, i32, i32, i32) {
    %c0_i32 = arith.constant 0 : i32
    %c0_i32_0 = arith.constant 0 : i32
    %c0_i32_1 = arith.constant 0 : i32
    %c0_i32_2 = arith.constant 0 : i32
    return %arg0, %c0_i32, %c0_i32_0, %c0_i32_1 : i32, i32, i32, i32
  }
}

</mosaic_0001>

<bundles_post_ra>
// kernel: tpu_custom_call.1
= control target key start
LH: loop header
LB: loop body
LE: loop exit
PB: predicated region body
PF: predicated region fallthrough
CT: control target
= control target key end

     0   :  { %6 = vsyncpa [#allocation3], 0  ;;  %s1156_s0 = inlined_call_operand.hbm [shape: f32[8,4,16,16], index: 0, kind: input, shape index: {}]   ;;  %s1157_s1 = inlined_call_operand.vmem [shape: f32[8,4,20,20], index: 1, kind: output, shape index: {}]  }
   0x1   :  { %8 = vsyncpa [#allocation3 + $0x1], 0  ;;  %s645_s6 = smov 0   ;;  %s647_s7 = smov 0  }
   0x2   :  { %s649_s8 = smov 0   ;;  %s651_s9 = smov 0  }
   0x3 LB: > { %s505_s10 = sadd.s32 4294967295, %s629_s9   ;;  %s665_s11 = sadd.s32 1, %s629_s9   ;;  %s629_s9 = sphi %s651_s9, %s1164_s9   ;;  %s625_s8 = sphi %s649_s8, %s1163_s8   ;;  %s621_s7 = sphi %s647_s7, %s1162_s7   ;;  %s617_s6 = sphi %s645_s6, %s1161_s6  }
   0x4   : > { %s18_s12 = ssub.s32 %s629_s9, %s665_s11  ;;  %s21_s13 = sadd.s32 1, %s625_s8 }
   0x5   : > { %p19_p0 = scmp.eq.s32.totalorder %s18_s12, 0  ;;  %p28_p1 = scmp.ne.s32.totalorder %s625_s8, %s621_s7 }
   0x6   : > { %p29_p2 = scmp.eq.s32.totalorder %s629_s9, 0  ;;  %p34_p3 = scmp.ne.s32.totalorder %s621_s7, %s617_s6 }
   0x7   : > { %s675_s14 = scalar_select %p19_p0, %s625_s8, %s21_s13  }
   0x8   : > { %p677_p4 = por %p29_p2, %p28_p1  ;;  %p35_p5 = scmp.eq.s32.totalorder %s505_s10, 0 }
   0x9   : > { %p528_p6 = scmp.lt.s32.totalorder %s629_s9, 2  ;;  %s84_s17 = sand.u32 1, %s625_s8  }
   0xa   : > { %p684_p7 = por %p35_p5, %p34_p3  ;;  %s509_s18 = sshll.u32 %s84_s17, 8 }
   0xb   : > { %s520_s19 = sshll.u32 %s629_s9, 8  ;;  %s88_s23 = scalar_lea.vmem [#allocation2], %s509_s18 }
   0xc   : > { %s94_s22 = scalar_lea.hbm %s1156_s0, %s520_s19  ;;  %s97_s24 = sshll.u32 %s88_s23, 4  ;;  %s98_s24 = int_to_ptr.vmem [resolvable:$true] %s97_s24 }
   0xd   : > { %s95_s25 = sshll.u32 %s94_s22, 4  ;;  %p695_p8 = pnand %p528_p6, %p677_p4  ;;  %s96_s25 = int_to_ptr.hbm [resolvable:$true] %s95_s25 }
   0xe   : > { %p513_p9 = scmp.ge.s32.totalorder %s629_s9, 1  ;;  %s85_s27 = scalar_lea.sflag [#allocation3], %s84_s17 }
   0xf   : > { %s565_s28 = sshra.s32 %s96_s25, 4  ;;  %p569_p11 = pneg %p695_p8  ;;  %s566_s28 = int_to_ptr.hbm [resolvable:$true] %s565_s28 }
  0x10   : > { %s567_s29 = scalar_lea.hbm %s566_s28, 256  ;;  %s572_s3 = scalar_lea.hbm %s1156_s0, 512 }
  0x11   : > { %p568_p10 = scmp.ne.s32.totalorder %s566_s28, %s567_s29  ;;  %p573_p0 = scmp.lt.s32.totalorder %s566_s28, %s1156_s0 }
  0x12   : > { %p574_p1 = scmp.lt.s32.totalorder %s572_s3, %s567_s29 }
  0x13   : > { %p570_p12 = pnand %p569_p11, %p568_p10 }
  0x14   : > { %p575_p2 = por %p574_p1, %p573_p0 }
  0x15   : > { %p571_p13 = pneg %p570_p12 }
  0x17   : > { %p576_p3 = pnand %p575_p2, %p571_p13 }
  0x19   : > { %579 = shalt.err (!%p576_p3)
}
  0x1a   : > { %s631_s6 = smov 128   ;;  %s632_s12 = smov 8  }
  0x1b   : > { %527 = dma.hbm_to_vmem [thread:$0]  (!%p695_p8), %s96_s25, 4096, %s98_s24, %s85_s27, %s631_s6, %s631_s6, %s632_s12  }
  0x1c   : > { %p105_p4 = scmp.lt.s32.totalorder %s629_s9, 3 }
  0x1e   : > { %p106_p5 = pnand %p513_p9, %p105_p4 }
  0x1f   : > { %s111_s13 = sand.u32 (!%p106_p5), 1, %s621_s7  }
  0x20   : > { %109 = sbr.rel (%p106_p5) target bundleno = 237 (0xed), region = 24  ;;  %s514_s15 = sshll.u32 (!%p106_p5), %s111_s13, 8 }
  0x21   : > { %s112_s17 = scalar_lea.sflag (!%p106_p5), [#allocation3], %s111_s13  ;;  %s714_s18 = scalar_lea.vmem (!%p106_p5), [#allocation2], %s514_s15 }
  0x25   : > { %612 = dma.done.wait (%p684_p7), %s112_s17, 4096  }
  0x26   : > { %614 = vsyncadd (%p684_p7), %s112_s17, 4294963200  ;;  %s515_s19 = sshll.u32 %s505_s10, 2  ;;  %vm144_vm0 = vcmask 156672   ;;  %v245_v0 = vld [vmem:[%s714_s18 + $0x10] sm:$0xff]  ;;  %v243_v1 = vld [vmem:[%s714_s18] sm:$0xff]  ;;  %v633_v2 = vmov 0.0  }
  0x27   : > { %p138_p6 = scmp.lt.s32.totalorder %s515_s19, 7  ;;  %s634_s9 = smov 2   ;;  %v247_v3 = vld [vmem:[%s714_s18 + $0x20] sm:$0xff]  ;;  %v246_v4 = vld [vmem:[%s714_s18 + $0x18] sm:$0xff]  ;;  %v244_v5 = vld [vmem:[%s714_s18 + $0x8] sm:$0xff]  ;;  %vm177_vm1 = vcmask 15360  }
  0x28   : > { %311 = vrot.lane.b32.xlu1 %v245_v0, %s634_s9  ;;  %307 = vrot.lane.b32.xlu0 %v243_v1, %s634_s9  ;;  %v248_v6 = vld [vmem:[%s714_s18 + $0x28] sm:$0xff]  ;;  %v250_v7 = vld [vmem:[%s714_s18 + $0x38] sm:$0xff]  ;;  %vm210_vm2 = vcmask 162960   ;;  %vm403_vm3 = vcmask 146448  }
  0x29   : > { %s1166_s19 = smov (!%p138_p6, %s515_s19), 7  ;;  %315 = vrot.lane.b32.xlu2 %v247_v3, %s634_s9  ;;  %v249_v8 = vld [vmem:[%s714_s18 + $0x30] sm:$0xff]  ;;  %v251_v9 = vld [vmem:[%s714_s18 + $0x40] sm:$0xff]  ;;  %v252_v11 = vld [vmem:[%s714_s18 + $0x48] sm:$0xff] }
  0x2a   : > { %s521_s20 = smul.u32 96, %s1166_s19  ;;  %v253_v10 = vld [vmem:[%s714_s18 + $0x50] sm:$0xff]  ;;  %v254_v12 = vld [vmem:[%s714_s18 + $0x58] sm:$0xff]  ;;  %v256_v13 = vld [vmem:[%s714_s18 + $0x68] sm:$0xff] }
  0x2b   : > { %v255_v14 = vld [vmem:[%s714_s18 + $0x60] sm:$0xff]  ;;  %v257_v15 = vld [vmem:[%s714_s18 + $0x70] sm:$0xff]  ;;  %v258_v17 = vld [vmem:[%s714_s18 + $0x78] sm:$0xff] }
  0x2c   : > { %s725_s23 = scalar_lea.vmem %s1157_s1, %s521_s20  ;;  %v259_v16 = vld [vmem:[%s714_s18 + $0x80] sm:$0xff]  ;;  %v260_v18 = vld [vmem:[%s714_s18 + $0x88] sm:$0xff]  ;;  %v262_v19 = vld [vmem:[%s714_s18 + $0x98] sm:$0xff] }
  0x2d   : > { %145 = vst.msk [vmem:[%s725_s23] sm:$0x3] %vm144_vm0, %v633_v2  ;;  %v261_v20 = vld [vmem:[%s714_s18 + $0x90] sm:$0xff]  ;;  %v263_v21 = vld [vmem:[%s714_s18 + $0xa0] sm:$0xff]  ;;  %v264_v23 = vld [vmem:[%s714_s18 + $0xa8] sm:$0xff] }
  0x2e   : > { %146 = vst.msk [vmem:[%s725_s23 + $0x18] sm:$0x3] %vm144_vm0, %v633_v2  ;;  %v265_v22 = vld [vmem:[%s714_s18 + $0xb0] sm:$0xff]  ;;  %v266_v24 = vld [vmem:[%s714_s18 + $0xb8] sm:$0xff]  ;;  %v268_v25 = vld [vmem:[%s714_s18 + $0xc8] sm:$0xff] }
  0x2f   : > { %147 = vst.msk [vmem:[%s725_s23 + $0x30] sm:$0x3] %vm144_vm0, %v633_v2  ;;  %v267_v26 = vld [vmem:[%s714_s18 + $0xc0] sm:$0xff]  ;;  %v269_v27 = vld [vmem:[%s714_s18 + $0xd0] sm:$0xff]  ;;  %v270_v29 = vld [vmem:[%s714_s18 + $0xd8] sm:$0xff] }
  0x30   : > { %148 = vst.msk [vmem:[%s725_s23 + $0x48] sm:$0x3] %vm144_vm0, %v633_v2  ;;  %313 = vrot.lane.b32.xlu1 %v246_v4, %s634_s9  ;;  %309 = vrot.lane.b32.xlu0 %v244_v5, %s634_s9  ;;  %v271_v28 = vld [vmem:[%s714_s18 + $0xe0] sm:$0xff] }
  0x31   : > { %149 = vst.msk [vmem:[%s725_s23 + $0x60] sm:$0x3] %vm144_vm0, %v633_v2  ;;  %317 = vrot.lane.b32.xlu2 %v248_v6, %s634_s9  ;;  %v272_v30 = vld [vmem:[%s714_s18 + $0xe8] sm:$0xff]  ;;  %v274_v31 = vld [vmem:[%s714_s18 + $0xf8] sm:$0xff] }
  0x32   : > { %150 = vst.msk [vmem:[%s725_s23 + $0x78] sm:$0x3] %vm144_vm0, %v633_v2  ;;  %v273_v32 = vld [vmem:[%s714_s18 + $0xf0] sm:$0xff] }
  0x33   : > { %151 = vst.msk [vmem:[%s725_s23 + $0x90] sm:$0x3] %vm144_vm0, %v633_v2 }
  0x34   : > { %152 = vst.msk [vmem:[%s725_s23 + $0xa8] sm:$0x3] %vm144_vm0, %v633_v2 }
  0x35   : > { %153 = vst.msk [vmem:[%s725_s23 + $0xc0] sm:$0x3] %vm144_vm0, %v633_v2 }
  0x36   : > { %154 = vst.msk [vmem:[%s725_s23 + $0xd8] sm:$0x3] %vm144_vm0, %v633_v2 }
  0x37   : > { %155 = vst.msk [vmem:[%s725_s23 + $0xf0] sm:$0x3] %vm144_vm0, %v633_v2 }
  0x38   : > { %156 = vst.msk [vmem:[%s725_s23 + $0x108] sm:$0x3] %vm144_vm0, %v633_v2  ;;  %321 = vrot.lane.b32.xlu1 %v250_v7, %s634_s9  ;;  %319 = vrot.lane.b32.xlu0 %v249_v8, %s634_s9 }
  0x39   : > { %157 = vst.msk [vmem:[%s725_s23 + $0x120] sm:$0x3] %vm144_vm0, %v633_v2  ;;  %323 = vrot.lane.b32.xlu2 %v251_v9, %s634_s9 }
  0x3a   : > { %158 = vst.msk [vmem:[%s725_s23 + $0x138] sm:$0x3] %vm144_vm0, %v633_v2 }
  0x3b   : > { %159 = vst.msk [vmem:[%s725_s23 + $0x150] sm:$0x3] %vm144_vm0, %v633_v2 }
  0x3c   : > { %160 = vst.msk [vmem:[%s725_s23 + $0x168] sm:$0x3] %vm144_vm0, %v633_v2 }
  0x3d   : > { %161 = vst.msk [vmem:[%s725_s23 + $0x12] sm:$0x3] %vm144_vm0, %v633_v2 }
  0x3e   : > { %162 = vst.msk [vmem:[%s725_s23 + $0x2a] sm:$0x3] %vm144_vm0, %v633_v2 }
  0x3f   : > { %163 = vst.msk [vmem:[%s725_s23 + $0x42] sm:$0x3] %vm144_vm0, %v633_v2 }
  0x40   : > { %164 = vst.msk [vmem:[%s725_s23 + $0x5a] sm:$0x3] %vm144_vm0, %v633_v2  ;;  %327 = vrot.lane.b32.xlu1 %v253_v10, %s634_s9  ;;  %325 = vrot.lane.b32.xlu0 %v252_v11, %s634_s9 }
  0x41   : > { %165 = vst.msk [vmem:[%s725_s23 + $0x72] sm:$0x3] %vm144_vm0, %v633_v2  ;;  %329 = vrot.lane.b32.xlu2 %v254_v12, %s634_s9 }
  0x42   : > { %166 = vst.msk [vmem:[%s725_s23 + $0x8a] sm:$0x3] %vm144_vm0, %v633_v2 }
  0x43   : > { %167 = vst.msk [vmem:[%s725_s23 + $0xa2] sm:$0x3] %vm144_vm0, %v633_v2 }
  0x44   : > { %168 = vst.msk [vmem:[%s725_s23 + $0xba] sm:$0x3] %vm144_vm0, %v633_v2 }
  0x45   : > { %169 = vst.msk [vmem:[%s725_s23 + $0xd2] sm:$0x3] %vm144_vm0, %v633_v2 }
  0x46   : > { %170 = vst.msk [vmem:[%s725_s23 + $0xea] sm:$0x3] %vm144_vm0, %v633_v2 }
  0x47   : > { %171 = vst.msk [vmem:[%s725_s23 + $0x102] sm:$0x3] %vm144_vm0, %v633_v2 }
  0x48   : > { %172 = vst.msk [vmem:[%s725_s23 + $0x11a] sm:$0x3] %vm144_vm0, %v633_v2  ;;  %333 = vrot.lane.b32.xlu1 %v256_v13, %s634_s9  ;;  %331 = vrot.lane.b32.xlu0 %v255_v14, %s634_s9 }
  0x49   : > { %173 = vst.msk [vmem:[%s725_s23 + $0x132] sm:$0x3] %vm144_vm0, %v633_v2  ;;  %335 = vrot.lane.b32.xlu2 %v257_v15, %s634_s9 }
  0x4a   : > { %174 = vst.msk [vmem:[%s725_s23 + $0x14a] sm:$0x3] %vm144_vm0, %v633_v2 }
  0x4b   : > { %175 = vst.msk [vmem:[%s725_s23 + $0x162] sm:$0x3] %vm144_vm0, %v633_v2 }
  0x4c   : > { %176 = vst.msk [vmem:[%s725_s23 + $0x17a] sm:$0x3] %vm144_vm0, %v633_v2 }
  0x4d   : > { %180 = vst.msk [vmem:[%s725_s23 + $0x1a] sm:$0xff] %vm177_vm1, %v633_v2 }
  0x4e   : > { %188 = vst.msk [vmem:[%s725_s23 + $0x7a] sm:$0xff] %vm177_vm1, %v633_v2 }
  0x4f   : > { %196 = vst.msk [vmem:[%s725_s23 + $0xda] sm:$0xff] %vm177_vm1, %v633_v2 }
  0x50   : > { %339 = vrot.lane.b32.xlu1 %v259_v16, %s634_s9  ;;  %337 = vrot.lane.b32.xlu0 %v258_v17, %s634_s9  ;;  %204 = vst.msk [vmem:[%s725_s23 + $0x13a] sm:$0xff] %vm177_vm1, %v633_v2 }
  0x51   : > { %341 = vrot.lane.b32.xlu2 %v260_v18, %s634_s9  ;;  %213 = vst.msk [vmem:[%s725_s23 + $0x1a] sm:$0xff] %vm210_vm2, %v633_v2 }
  0x52   : > { %221 = vst.msk [vmem:[%s725_s23 + $0x7a] sm:$0xff] %vm210_vm2, %v633_v2 }
  0x53   : > { %229 = vst.msk [vmem:[%s725_s23 + $0xda] sm:$0xff] %vm210_vm2, %v633_v2 }
  0x54   : > { %237 = vst.msk [vmem:[%s725_s23 + $0x13a] sm:$0xff] %vm210_vm2, %v633_v2 }
  0x55   : > { %178 = vst.msk [vmem:[%s725_s23 + $0x2] sm:$0xff] %vm177_vm1, %v633_v2 }
  0x56   : > { %179 = vst.msk [vmem:[%s725_s23 + $0xa] sm:$0xff] %vm177_vm1, %v633_v2 }
  0x57   : > { %181 = vst.msk [vmem:[%s725_s23 + $0x22] sm:$0xff] %vm177_vm1, %v633_v2 }
  0x58   : > { %345 = vrot.lane.b32.xlu1 %v262_v19, %s634_s9  ;;  %343 = vrot.lane.b32.xlu0 %v261_v20, %s634_s9  ;;  %182 = vst.msk [vmem:[%s725_s23 + $0x32] sm:$0xff] %vm177_vm1, %v633_v2 }
  0x59   : > { %347 = vrot.lane.b32.xlu2 %v263_v21, %s634_s9  ;;  %183 = vst.msk [vmem:[%s725_s23 + $0x3a] sm:$0xff] %vm177_vm1, %v633_v2 }
  0x5a   : > { %184 = vst.msk [vmem:[%s725_s23 + $0x4a] sm:$0xff] %vm177_vm1, %v633_v2 }
  0x5b   : > { %185 = vst.msk [vmem:[%s725_s23 + $0x52] sm:$0xff] %vm177_vm1, %v633_v2 }
  0x5c   : > { %186 = vst.msk [vmem:[%s725_s23 + $0x62] sm:$0xff] %vm177_vm1, %v633_v2 }
  0x5d   : > { %194 = vst.msk [vmem:[%s725_s23 + $0xc2] sm:$0xff] %vm177_vm1, %v633_v2 }
  0x5e   : > { %202 = vst.msk [vmem:[%s725_s23 + $0x122] sm:$0xff] %vm177_vm1, %v633_v2 }
  0x5f   : > { %211 = vst.msk [vmem:[%s725_s23 + $0x2] sm:$0xff] %vm210_vm2, %v633_v2 }
  0x60   : > { %351 = vrot.lane.b32.xlu1 %v265_v22, %s634_s9  ;;  %349 = vrot.lane.b32.xlu0 %v264_v23, %s634_s9  ;;  %219 = vst.msk [vmem:[%s725_s23 + $0x62] sm:$0xff] %vm210_vm2, %v633_v2 }
  0x61   : > { %353 = vrot.lane.b32.xlu2 %v266_v24, %s634_s9  ;;  %227 = vst.msk [vmem:[%s725_s23 + $0xc2] sm:$0xff] %vm210_vm2, %v633_v2 }
  0x62   : > { %235 = vst.msk [vmem:[%s725_s23 + $0x122] sm:$0xff] %vm210_vm2, %v633_v2 }
  0x63   : > { %187 = vst.msk [vmem:[%s725_s23 + $0x6a] sm:$0xff] %vm177_vm1, %v633_v2 }
  0x64   : > { %189 = vst.msk [vmem:[%s725_s23 + $0x82] sm:$0xff] %vm177_vm1, %v633_v2 }
  0x65   : > { %190 = vst.msk [vmem:[%s725_s23 + $0x92] sm:$0xff] %vm177_vm1, %v633_v2 }
  0x66   : > { %191 = vst.msk [vmem:[%s725_s23 + $0x9a] sm:$0xff] %vm177_vm1, %v633_v2 }
  0x67   : > { %192 = vst.msk [vmem:[%s725_s23 + $0xaa] sm:$0xff] %vm177_vm1, %v633_v2 }
  0x68   : > { %357 = vrot.lane.b32.xlu1 %v268_v25, %s634_s9  ;;  %355 = vrot.lane.b32.xlu0 %v267_v26, %s634_s9  ;;  %193 = vst.msk [vmem:[%s725_s23 + $0xb2] sm:$0xff] %vm177_vm1, %v633_v2 }
  0x69   : > { %359 = vrot.lane.b32.xlu2 %v269_v27, %s634_s9  ;;  %198 = vst.msk [vmem:[%s725_s23 + $0xf2] sm:$0xff] %vm177_vm1, %v633_v2 }
  0x6a   : > { %206 = vst.msk [vmem:[%s725_s23 + $0x152] sm:$0xff] %vm177_vm1, %v633_v2 }
  0x6b   : > { %215 = vst.msk [vmem:[%s725_s23 + $0x32] sm:$0xff] %vm210_vm2, %v633_v2 }
  0x6c   : > { %223 = vst.msk [vmem:[%s725_s23 + $0x92] sm:$0xff] %vm210_vm2, %v633_v2 }
  0x6d   : > { %231 = vst.msk [vmem:[%s725_s23 + $0xf2] sm:$0xff] %vm210_vm2, %v633_v2 }
  0x6e   : > { %239 = vst.msk [vmem:[%s725_s23 + $0x152] sm:$0xff] %vm210_vm2, %v633_v2 }
  0x6f   : > { %195 = vst.msk [vmem:[%s725_s23 + $0xca] sm:$0xff] %vm177_vm1, %v633_v2 }
  0x70   : > { %363 = vrot.lane.b32.xlu1 %v271_v28, %s634_s9  ;;  %361 = vrot.lane.b32.xlu0 %v270_v29, %s634_s9  ;;  %197 = vst.msk [vmem:[%s725_s23 + $0xe2] sm:$0xff] %vm177_vm1, %v633_v2 }
  0x71   : > { %365 = vrot.lane.b32.xlu2 %v272_v30, %s634_s9  ;;  %199 = vst.msk [vmem:[%s725_s23 + $0xfa] sm:$0xff] %vm177_vm1, %v633_v2 }
  0x72   : > { %200 = vst.msk [vmem:[%s725_s23 + $0x10a] sm:$0xff] %vm177_vm1, %v633_v2 }
  0x73   : > { %201 = vst.msk [vmem:[%s725_s23 + $0x112] sm:$0xff] %vm177_vm1, %v633_v2 }
  0x74   : > { %205 = vst.msk [vmem:[%s725_s23 + $0x142] sm:$0xff] %vm177_vm1, %v633_v2 }
  0x75   : > { %214 = vst.msk [vmem:[%s725_s23 + $0x22] sm:$0xff] %vm210_vm2, %v633_v2 }
  0x76   : > { %222 = vst.msk [vmem:[%s725_s23 + $0x82] sm:$0xff] %vm210_vm2, %v633_v2 }
  0x77   : > { %230 = vst.msk [vmem:[%s725_s23 + $0xe2] sm:$0xff] %vm210_vm2, %v633_v2 }
  0x78   : > { %369 = vrot.lane.b32.xlu1 %v274_v31, %s634_s9  ;;  %367 = vrot.lane.b32.xlu0 %v273_v32, %s634_s9  ;;  %238 = vst.msk [vmem:[%s725_s23 + $0x142] sm:$0xff] %vm210_vm2, %v633_v2 }
  0x79   : > { %203 = vst.msk [vmem:[%s725_s23 + $0x12a] sm:$0xff] %vm177_vm1, %v633_v2 }
  0x7a   : > { %207 = vst.msk [vmem:[%s725_s23 + $0x15a] sm:$0xff] %vm177_vm1, %v633_v2 }
  0x7b   : > { %208 = vst.msk [vmem:[%s725_s23 + $0x16a] sm:$0xff] %vm177_vm1, %v633_v2 }
  0x7c   : > { %209 = vst.msk [vmem:[%s725_s23 + $0x172] sm:$0xff] %vm177_vm1, %v633_v2 }
  0x7d   : > { %212 = vst.msk [vmem:[%s725_s23 + $0xa] sm:$0xff] %vm210_vm2, %v633_v2 }
  0x7e   : > { %220 = vst.msk [vmem:[%s725_s23 + $0x6a] sm:$0xff] %vm210_vm2, %v633_v2 }
  0x7f   : > { %228 = vst.msk [vmem:[%s725_s23 + $0xca] sm:$0xff] %vm210_vm2, %v633_v2 }
  0x80   : > { %236 = vst.msk [vmem:[%s725_s23 + $0x12a] sm:$0xff] %vm210_vm2, %v633_v2 }
  0x81   : > { %216 = vst.msk [vmem:[%s725_s23 + $0x3a] sm:$0xff] %vm210_vm2, %v633_v2 }
  0x82   : > { %217 = vst.msk [vmem:[%s725_s23 + $0x4a] sm:$0xff] %vm210_vm2, %v633_v2 }
  0x83   : > { %v316_v33 = vpop.permute.xlu2 %315  ;;  %218 = vst.msk [vmem:[%s725_s23 + $0x52] sm:$0xff] %vm210_vm2, %v633_v2 }
  0x84   : > { %408 = vst.msk [vmem:[%s725_s23 + $0x32] sm:$0xff] %vm403_vm3, %v316_v33 }
  0x85   : > { %224 = vst.msk [vmem:[%s725_s23 + $0x9a] sm:$0xff] %vm210_vm2, %v633_v2 }
  0x86   : > { %232 = vst.msk [vmem:[%s725_s23 + $0xfa] sm:$0xff] %vm210_vm2, %v633_v2 }
  0x87   : > { %240 = vst.msk [vmem:[%s725_s23 + $0x15a] sm:$0xff] %vm210_vm2, %v633_v2 }
  0x88   : > { %225 = vst.msk [vmem:[%s725_s23 + $0xaa] sm:$0xff] %vm210_vm2, %v633_v2 }
  0x89   : > { %226 = vst.msk [vmem:[%s725_s23 + $0xb2] sm:$0xff] %vm210_vm2, %v633_v2 }
  0x8a   : > { %234 = vst.msk [vmem:[%s725_s23 + $0x112] sm:$0xff] %vm210_vm2, %v633_v2 }
  0x8b   : > { %v318_v34 = vpop.permute.xlu2 %317  ;;  %242 = vst.msk [vmem:[%s725_s23 + $0x172] sm:$0xff] %vm210_vm2, %v633_v2 }
  0x8c   : > { %409 = vst.msk [vmem:[%s725_s23 + $0x3a] sm:$0xff] %vm403_vm3, %v318_v34 }
  0x8d   : > { %233 = vst.msk [vmem:[%s725_s23 + $0x10a] sm:$0xff] %vm210_vm2, %v633_v2 }
  0x8e   : > { %241 = vst.msk [vmem:[%s725_s23 + $0x16a] sm:$0xff] %vm210_vm2, %v633_v2 }
  0x93   : > { %v324_v35 = vpop.permute.xlu2 %323 }
  0x94   : > { %412 = vst.msk [vmem:[%s725_s23 + $0x62] sm:$0xff] %vm403_vm3, %v324_v35 }
  0x9a   : > { %v312_v36 = vpop.permute.xlu1 %311  ;;  %v308_v37 = vpop.permute.xlu0 %307 }
  0x9b   : > { %406 = vst.msk [vmem:[%s725_s23 + $0x1a] sm:$0xff] %vm403_vm3, %v312_v36  ;;  %v330_v38 = vpop.permute.xlu2 %329 }
  0x9c   : > { %404 = vst.msk [vmem:[%s725_s23 + $0x2] sm:$0xff] %vm403_vm3, %v308_v37 }
  0x9d   : > { %415 = vst.msk [vmem:[%s725_s23 + $0x82] sm:$0xff] %vm403_vm3, %v330_v38 }
  0xa2   : > { %v314_v39 = vpop.permute.xlu1 %313  ;;  %v310_v40 = vpop.permute.xlu0 %309 }
  0xa3   : > { %407 = vst.msk [vmem:[%s725_s23 + $0x22] sm:$0xff] %vm403_vm3, %v314_v39  ;;  %v336_v41 = vpop.permute.xlu2 %335 }
  0xa4   : > { %405 = vst.msk [vmem:[%s725_s23 + $0xa] sm:$0xff] %vm403_vm3, %v310_v40 }
  0xa5   : > { %418 = vst.msk [vmem:[%s725_s23 + $0xaa] sm:$0xff] %vm403_vm3, %v336_v41 }
  0xaa   : > { %v322_v42 = vpop.permute.xlu1 %321  ;;  %v320_v43 = vpop.permute.xlu0 %319 }
  0xab   : > { %411 = vst.msk [vmem:[%s725_s23 + $0x52] sm:$0xff] %vm403_vm3, %v322_v42  ;;  %v342_v44 = vpop.permute.xlu2 %341 }
  0xac   : > { %410 = vst.msk [vmem:[%s725_s23 + $0x4a] sm:$0xff] %vm403_vm3, %v320_v43 }
  0xad   : > { %421 = vst.msk [vmem:[%s725_s23 + $0xca] sm:$0xff] %vm403_vm3, %v342_v44 }
  0xb2   : > { %v328_v45 = vpop.permute.xlu1 %327  ;;  %v326_v46 = vpop.permute.xlu0 %325 }
  0xb3   : > { %414 = vst.msk [vmem:[%s725_s23 + $0x7a] sm:$0xff] %vm403_vm3, %v328_v45  ;;  %v348_v47 = vpop.permute.xlu2 %347 }
  0xb4   : > { %413 = vst.msk [vmem:[%s725_s23 + $0x6a] sm:$0xff] %vm403_vm3, %v326_v46 }
  0xb5   : > { %424 = vst.msk [vmem:[%s725_s23 + $0xf2] sm:$0xff] %vm403_vm3, %v348_v47 }
  0xba   : > { %v334_v48 = vpop.permute.xlu1 %333  ;;  %v332_v49 = vpop.permute.xlu0 %331 }
  0xbb   : > { %417 = vst.msk [vmem:[%s725_s23 + $0x9a] sm:$0xff] %vm403_vm3, %v334_v48  ;;  %v354_v50 = vpop.permute.xlu2 %353 }
  0xbc   : > { %416 = vst.msk [vmem:[%s725_s23 + $0x92] sm:$0xff] %vm403_vm3, %v332_v49 }
  0xbd   : > { %427 = vst.msk [vmem:[%s725_s23 + $0x112] sm:$0xff] %vm403_vm3, %v354_v50 }
  0xc2   : > { %v340_v51 = vpop.permute.xlu1 %339  ;;  %v338_v52 = vpop.permute.xlu0 %337 }
  0xc3   : > { %420 = vst.msk [vmem:[%s725_s23 + $0xc2] sm:$0xff] %vm403_vm3, %v340_v51  ;;  %v360_v53 = vpop.permute.xlu2 %359 }
  0xc4   : > { %419 = vst.msk [vmem:[%s725_s23 + $0xb2] sm:$0xff] %vm403_vm3, %v338_v52 }
  0xc5   : > { %430 = vst.msk [vmem:[%s725_s23 + $0x13a] sm:$0xff] %vm403_vm3, %v360_v53 }
  0xca   : > { %v346_v54 = vpop.permute.xlu1 %345  ;;  %v344_v55 = vpop.permute.xlu0 %343 }
  0xcb   : > { %423 = vst.msk [vmem:[%s725_s23 + $0xe2] sm:$0xff] %vm403_vm3, %v346_v54  ;;  %v366_v56 = vpop.permute.xlu2 %365 }
  0xcc   : > { %422 = vst.msk [vmem:[%s725_s23 + $0xda] sm:$0xff] %vm403_vm3, %v344_v55 }
  0xcd   : > { %433 = vst.msk [vmem:[%s725_s23 + $0x15a] sm:$0xff] %vm403_vm3, %v366_v56 }
  0xd2   : > { %v352_v57 = vpop.permute.xlu1 %351  ;;  %v350_v58 = vpop.permute.xlu0 %349 }
  0xd3   : > { %426 = vst.msk [vmem:[%s725_s23 + $0x10a] sm:$0xff] %vm403_vm3, %v352_v57 }
  0xd4   : > { %425 = vst.msk [vmem:[%s725_s23 + $0xfa] sm:$0xff] %vm403_vm3, %v350_v58 }
  0xda   : > { %v358_v59 = vpop.permute.xlu1 %357  ;;  %v356_v60 = vpop.permute.xlu0 %355 }
  0xdb   : > { %429 = vst.msk [vmem:[%s725_s23 + $0x12a] sm:$0xff] %vm403_vm3, %v358_v59 }
  0xdc   : > { %428 = vst.msk [vmem:[%s725_s23 + $0x122] sm:$0xff] %vm403_vm3, %v356_v60 }
  0xe2   : > { %v364_v61 = vpop.permute.xlu1 %363  ;;  %v362_v62 = vpop.permute.xlu0 %361 }
  0xe3   : > { %432 = vst.msk [vmem:[%s725_s23 + $0x152] sm:$0xff] %vm403_vm3, %v364_v61 }
  0xe4   : > { %431 = vst.msk [vmem:[%s725_s23 + $0x142] sm:$0xff] %vm403_vm3, %v362_v62 }
  0xea   : > { %v370_v63 = vpop.permute.xlu1 %369  ;;  %v368_v0 = vpop.permute.xlu0 %367 }
  0xeb   : > { %435 = vst.msk [vmem:[%s725_s23 + $0x172] sm:$0xff] %vm403_vm3, %v370_v63 }
  0xec   : > { %434 = vst.msk [vmem:[%s725_s23 + $0x16a] sm:$0xff] %vm403_vm3, %v368_v0 }
  0xed PF: > { %p11_p7 = scmp.ge.s32.totalorder %s665_s11, 4   ;;  %s1161_s6 = smov %s621_s7 }
  0xee   : > { %s1162_s7 = smov %s625_s8  ;;  %s1163_s8 = smov %s675_s14 }
  0xef   : > { %s1164_s9 = smov %s665_s11  ;;  %13 = sbr.rel (!%p11_p7) target bundleno = 3 (0x3), region = 64 }
  0xf4   :  { %460 = vsyncpa [#allocation3], 1 }
  0xf5   :  { %462 = vsyncpa [#allocation3 + $0x1], 1 }

</bundles_post_ra>
